<compile_context>
chip_gen: v7x
topology: tpu7x:2x2x1
jax: 0.10.0
libtpu: 0.0.40
codegen_flags: <defaults>
</compile_context>

<pallas_src>
import jax
import jax.numpy as jnp
from jax.experimental import pallas as pl
from jax.experimental.pallas import tpu as pltpu

LANE = 128
SUBLANE = 8
VMEM_BUDGET = 24 * 1024 * 1024       # conservative per-step budget (all gens)
VMEM_LIMIT_CAP = 48 * 1024 * 1024    # never ask for more than fits v7x scoped VMEM


def _round_up(x, m):
    return ((x + m - 1) // m) * m


def _pad2d(a, rows, cols):
    out = jnp.zeros((rows, cols), a.dtype)
    return out.at[: a.shape[0], : a.shape[1]].set(a)


def generator_moon_kernel(lbl_ref, z_ref, tt_ref, w1_ref, w2_ref, w3_ref, o_ref):
    """Fused Generator_moon forward for one batch tile.

       t  = onehot(label) @ T        (T = emb_table @ W1_emb, precomputed, VMEM-resident)
       h1 = relu(z @ W1_z + t)
       h2 = relu(h1 @ W2)
       o  = h2 @ W3
    bf16 MXU inputs, f32 accumulation, f32 ReLU (works on v5e/v6e/v7x).
    """
    bb = lbl_ref.shape[0]
    ncp = tt_ref.shape[0]

    # In-kernel label gather as an exact one-hot matmul (0/1 are exact in bf16,
    # so this is bit-identical to a jnp.take of the bf16 table).
    lbl = lbl_ref[...]                                             # [bb, 1] int32
    classes = jax.lax.broadcasted_iota(jnp.int32, (bb, ncp), 1)
    onehot = (classes == lbl).astype(jnp.bfloat16)                 # [bb, ncp]
    t = jnp.dot(onehot, tt_ref[...], preferred_element_type=jnp.float32)

    z = z_ref[...].astype(jnp.bfloat16)
    h1 = jnp.dot(z, w1_ref[...], preferred_element_type=jnp.float32) + t
    h1 = jnp.maximum(h1, 0.0).astype(jnp.bfloat16)
    h2 = jnp.dot(h1, w2_ref[...], preferred_element_type=jnp.float32)
    h2 = jnp.maximum(h2, 0.0).astype(jnp.bfloat16)
    out = jnp.dot(h2, w3_ref[...], preferred_element_type=jnp.float32)
    o_ref[...] = out.astype(o_ref.dtype)


def _vmem_bytes(bb, z_dim, ncp, h1p, h2p, dp, out_bytes):
    """Rough per-grid-step VMEM estimate (double-buffered I/O + temporaries)."""
    streams = 2 * bb * (z_dim * 4 + 4 + dp * out_bytes)            # z + label + out
    weights = 2 * 2 * (z_dim * h1p + ncp * h1p + h1p * h2p + h2p * dp)
    temps = bb * (ncp * 2 + h1p * 6 + h2p * 6 + dp * 4)            # onehot, h1, h2, acc
    return streams + weights + temps


def _choose_batch_tile(B, block_b, z_dim, ncp, h1p, h2p, dp, out_bytes):
    if B > block_b:
        bb = block_b
    elif B >= 512:
        # Split into (at least) 2 tiles so both v7x TensorCores get work;
        # a no-op cost-wise on single-core v5e/v6e.
        bb = _round_up((B + 1) // 2, SUBLANE)
    else:
        bb = _round_up(max(B, SUBLANE), SUBLANE)
    # Shrink if the tile would blow the conservative VMEM budget.
    while bb > 256 and _vmem_bytes(bb, z_dim, ncp, h1p, h2p, dp, out_bytes) > VMEM_BUDGET:
        bb = _round_up(bb // 2, SUBLANE)
    return bb


def generator_moon_forward(z, label, params, *, block_b=1024,
                           out_dtype=jnp.bfloat16, return_padded=False):
    """Fused, padded Generator_moon MLP with the label path folded into a table."""
    w1_z = params["w1_z"]          # [z_dim, H1P]   bf16
    t_table = params["t_table"]    # [NCP,  H1P]    bf16  (= emb @ W1_emb, padded)
    w2 = params["w2"]              # [H1P,  H2P]    bf16
    w3 = params["w3"]              # [H2P,  DP]     bf16
    dim = params["dim"]

    B, z_dim = z.shape
    ncp, h1p = t_table.shape
    h2p = w2.shape[1]
    dp = w3.shape[1]
    out_bytes = jnp.dtype(out_dtype).itemsize

    bb = _choose_batch_tile(B, block_b, z_dim, ncp, h1p, h2p, dp, out_bytes)
    b_pad = _round_up(B, bb)
    nb = b_pad // bb

    lbl = label.astype(jnp.int32).reshape(B, 1)
    if b_pad > B:
        # Pad batch to a tile multiple (keeps the pipelined fast path; padded
        # rows use class 0 / zero z and are sliced away below).
        z = jnp.pad(z, ((0, b_pad - B), (0, 0)))
        lbl = jnp.pad(lbl, ((0, b_pad - B), (0, 0)))

    est = _vmem_bytes(bb, z_dim, ncp, h1p, h2p, dp, out_bytes)
    vmem_limit = None
    if est > 12 * 1024 * 1024:
        vmem_limit = min(int(est * 3 // 2), VMEM_LIMIT_CAP)

    out_padded = pl.pallas_call(
        generator_moon_kernel,
        out_shape=jax.ShapeDtypeStruct((b_pad, dp), out_dtype),
        grid=(nb,),
        in_specs=[
            pl.BlockSpec((bb, 1), lambda i: (i, 0)),        # labels    [bb, 1] int32
            pl.BlockSpec((bb, z_dim), lambda i: (i, 0)),    # z         [bb, z_dim]
            pl.BlockSpec((ncp, h1p), lambda i: (0, 0)),     # T table (VMEM-resident)
            pl.BlockSpec((z_dim, h1p), lambda i: (0, 0)),   # W1_z
            pl.BlockSpec((h1p, h2p), lambda i: (0, 0)),     # W2
            pl.BlockSpec((h2p, dp), lambda i: (0, 0)),      # W3
        ],
        out_specs=pl.BlockSpec((bb, dp), lambda i: (i, 0)),  # lane-dense bf16 slab
        compiler_params=pltpu.CompilerParams(
            dimension_semantics=("parallel",),
            vmem_limit_bytes=vmem_limit),
    )(lbl, z, t_table, w1_z, w2, w3)

    if return_padded:
        return out_padded            # [b_pad, DP]; let the consumer fuse the slice
    return out_padded[:B, :dim]


def init_params(key, *, n_classes, label_dim, z_dim, hidden_dim, dim):
    """Synthetic params matching Generator_moon.__init__; pre-split, pre-padded,
    pre-quantized ONCE here (not per call)."""
    h1, h2 = 4 * hidden_dim, 2 * hidden_dim
    h1p, h2p, dp = _round_up(h1, LANE), _round_up(h2, LANE), _round_up(dim, LANE)
    ncp = _round_up(n_classes, SUBLANE)
    in_channels = z_dim + label_dim

    k_emb, k1, k2, k3 = jax.random.split(key, 4)
    # nn.Embedding(n_classes, label_dim)
    emb = jax.random.normal(k_emb, (n_classes, label_dim), jnp.float32)
    # Linear weights stored as [in, out] (PyTorch W.T) so kernels do x @ W.
    w1 = jax.random.normal(k1, (in_channels, h1), jnp.float32) * 0.1
    w2 = jax.random.normal(k2, (h1, h2), jnp.float32) * 0.1
    w3 = jax.random.normal(k3, (h2, dim), jnp.float32) * 0.1

    # Split W1 into z-columns and embedding-columns; fold the embedding matmul
    # into a per-class table:  T[c] = emb[c] @ W1_emb.
    w1_z, w1_emb = w1[:z_dim], w1[z_dim:]
    t_table = emb @ w1_emb                       # [n_classes, h1]

    params = {
        "w1_z": _pad2d(w1_z, z_dim, h1p).astype(jnp.bfloat16),
        "t_table": _pad2d(t_table, ncp, h1p).astype(jnp.bfloat16),
        "w2": _pad2d(w2, h1p, h2p).astype(jnp.bfloat16),
        "w3": _pad2d(w3, h2p, dp).astype(jnp.bfloat16),
        "dim": dim,
        # un-padded f32 originals kept only for the reference checks below
        "emb_f32": emb, "w1_f32": w1, "w2_f32": w2, "w3_f32": w3,
    }
    return params


def _ref_f32(z, label, params):
    """Original module semantics in full f32 (loose reference)."""
    emb_rows = jnp.take(params["emb_f32"], label, axis=0)
    x = jnp.concatenate([z, emb_rows], axis=1)
    r = jnp.maximum(x @ params["w1_f32"], 0.0)
    r = jnp.maximum(r @ params["w2_f32"], 0.0)
    return r @ params["w3_f32"]


if __name__ == "__main__":
    # Small opt-like configuration:
    #   teacher.lin.weight.size(1) = 4, student.lin.weight.size(1) = 4
    #   opt.dim = 8, opt.label_dim = 8, opt.hidden_dim = 16, opt.n_classes = 10
    teacher_in, student_in = 4, 4
    dim, label_dim, hidden_dim, n_classes = 8, 8, 16, 10
    z_dim = teacher_in + student_in + dim       # 16
    B = 8

    key = jax.random.PRNGKey(0)
    k_z, k_lbl, k_p, k_z2, k_lbl2 = jax.random.split(key, 5)

    params = init_params(k_p, n_classes=n_classes, label_dim=label_dim,
                         z_dim=z_dim, hidden_dim=hidden_dim, dim=dim)
    z = jax.random.normal(k_z, (B, z_dim), jnp.float32)
    label = jax.random.randint(k_lbl, (B,), 0, n_classes, jnp.int32)

    out = jax.block_until_ready(generator_moon_forward(z, label, params))
    assert out.shape == (B, dim)
    out_f32 = out.astype(jnp.float32)

    # Reference 1 (tight): identical bf16 math with the same padded params
    # (jnp.take of T is equivalent to the in-kernel exact one-hot matmul).
    t = jnp.take(params["t_table"], label, axis=0)
    h1 = jnp.dot(z.astype(jnp.bfloat16), params["w1_z"],
                 preferred_element_type=jnp.float32)
    h1 = jnp.maximum(h1 + t.astype(jnp.float32), 0.0).astype(jnp.bfloat16)
    h2 = jnp.maximum(jnp.dot(h1, params["w2"],
                             preferred_element_type=jnp.float32),
                     0.0).astype(jnp.bfloat16)
    ref_bf16 = jnp.dot(h2, params["w3"],
                       preferred_element_type=jnp.float32)[:, :dim]
    assert jnp.allclose(out_f32, ref_bf16, atol=2e-2, rtol=2e-2)

    # Reference 2 (loose): original module semantics in full f32 — checks that
    # W1 split / padding / bf16 quantization preserved the forward pass.
    # NOTE: matmul inputs and the output slab are bf16, so only loose parity
    # with PyTorch f32 is expected.
    assert jnp.allclose(out_f32, _ref_f32(z, label, params), atol=5e-2, rtol=5e-2)

    # Exercise the multi-tile / padded-batch path (non-divisible B, nb >= 2).
    B2 = 520
    z2 = jax.random.normal(k_z2, (B2, z_dim), jnp.float32)
    label2 = jax.random.randint(k_lbl2, (B2,), 0, n_classes, jnp.int32)
    out2 = jax.block_until_ready(generator_moon_forward(z2, label2, params))
    assert out2.shape == (B2, dim)
    assert jnp.allclose(out2.astype(jnp.float32), _ref_f32(z2, label2, params),
                        atol=5e-2, rtol=5e-2)

    print("KERNEL_OK")
</pallas_src>

<mosaic_0001>
module attributes {stable_mosaic.version = 11 : i64} {
  func.func @generator_moon_kernel(%arg0: i32, %arg1: memref<8x1xi32, #tpu.memory_space<vmem>>, %arg2: memref<8x16xf32, #tpu.memory_space<vmem>>, %arg3: memref<16x128xbf16, #tpu.memory_space<vmem>>, %arg4: memref<16x128xbf16, #tpu.memory_space<vmem>>, %arg5: memref<128x128xbf16, #tpu.memory_space<vmem>>, %arg6: memref<128x128xbf16, #tpu.memory_space<vmem>>, %arg7: memref<8x128xbf16, #tpu.memory_space<vmem>>) attributes {dimension_semantics = [#tpu.dimension_semantics<parallel>], iteration_bounds = array<i64: 1>, scalar_prefetch = 0 : i64, scratch_operands = 0 : i64, tpu.core_type = #tpu.core_type<tc>, window_params = [{transform_indices = @transform_0, window_bounds = array<i64: 8, 1>}, {transform_indices = @transform_1, window_bounds = array<i64: 8, 16>}, {pipeline_mode = #tpu.pipeline_mode<synchronous>, transform_indices = @transform_2, window_bounds = array<i64: 16, 128>}, {pipeline_mode = #tpu.pipeline_mode<synchronous>, transform_indices = @transform_3, window_bounds = array<i64: 16, 128>}, {pipeline_mode = #tpu.pipeline_mode<synchronous>, transform_indices = @transform_4, window_bounds = array<i64: 128, 128>}, {pipeline_mode = #tpu.pipeline_mode<synchronous>, transform_indices = @transform_5, window_bounds = array<i64: 128, 128>}, {transform_indices = @transform_6, window_bounds = array<i64: 8, 128>}]} {
    %c0 = arith.constant 0 : index
    %c0_0 = arith.constant 0 : index
    %0 = vector.load %arg1[%c0, %c0_0] : memref<8x1xi32, #tpu.memory_space<vmem>>, vector<8x1xi32>
    %1 = tpu.iota {dimensions = array<i32: 1>} : vector<8x16xi32>
    %2 = vector.broadcast %0 : vector<8x1xi32> to vector<8x16xi32>
    %3 = arith.cmpi eq, %1, %2 : vector<8x16xi32>
    %4 = arith.extui %3 : vector<8x16xi1> to vector<8x16xi32>
    %5 = arith.sitofp %4 : vector<8x16xi32> to vector<8x16xf32>
    %6 = arith.truncf %5 : vector<8x16xf32> to vector<8x16xbf16>
    %c0_1 = arith.constant 0 : index
    %c0_2 = arith.constant 0 : index
    %7 = vector.load %arg3[%c0_1, %c0_2] : memref<16x128xbf16, #tpu.memory_space<vmem>>, vector<16x128xbf16>
    %cst = arith.constant dense<0.000000e+00> : vector<8x128xf32>
    %8 = tpu.matmul %6, %7, %cst {dimension_numbers = #tpu.dot_dimension_numbers<[1], [0], [0], [1], [0, 0, 1, 1], [], []>} : vector<8x16xbf16>, vector<16x128xbf16>, vector<8x128xf32> -> vector<8x128xf32>
    %c0_3 = arith.constant 0 : index
    %c0_4 = arith.constant 0 : index
    %9 = vector.load %arg2[%c0_3, %c0_4] : memref<8x16xf32, #tpu.memory_space<vmem>>, vector<8x16xf32>
    %10 = arith.truncf %9 : vector<8x16xf32> to vector<8x16xbf16>
    %c0_5 = arith.constant 0 : index
    %c0_6 = arith.constant 0 : index
    %11 = vector.load %arg4[%c0_5, %c0_6] : memref<16x128xbf16, #tpu.memory_space<vmem>>, vector<16x128xbf16>
    %cst_7 = arith.constant dense<0.000000e+00> : vector<8x128xf32>
    %12 = tpu.matmul %10, %11, %cst_7 {dimension_numbers = #tpu.dot_dimension_numbers<[1], [0], [0], [1], [0, 0, 1, 1], [], []>} : vector<8x16xbf16>, vector<16x128xbf16>, vector<8x128xf32> -> vector<8x128xf32>
    %13 = arith.addf %12, %8 : vector<8x128xf32>
    %cst_8 = arith.constant 0.000000e+00 : f32
    %14 = vector.broadcast %cst_8 : f32 to vector<8x128xf32>
    %15 = arith.maximumf %13, %14 : vector<8x128xf32>
    %16 = arith.truncf %15 : vector<8x128xf32> to vector<8x128xbf16>
    %c0_9 = arith.constant 0 : index
    %c0_10 = arith.constant 0 : index
    %17 = vector.load %arg5[%c0_9, %c0_10] : memref<128x128xbf16, #tpu.memory_space<vmem>>, vector<128x128xbf16>
    %cst_11 = arith.constant dense<0.000000e+00> : vector<8x128xf32>
    %18 = tpu.matmul %16, %17, %cst_11 {dimension_numbers = #tpu.dot_dimension_numbers<[1], [0], [0], [1], [0, 0, 1, 1], [], []>} : vector<8x128xbf16>, vector<128x128xbf16>, vector<8x128xf32> -> vector<8x128xf32>
    %cst_12 = arith.constant 0.000000e+00 : f32
    %19 = vector.broadcast %cst_12 : f32 to vector<8x128xf32>
    %20 = arith.maximumf %18, %19 : vector<8x128xf32>
    %21 = arith.truncf %20 : vector<8x128xf32> to vector<8x128xbf16>
    %c0_13 = arith.constant 0 : index
    %c0_14 = arith.constant 0 : index
    %22 = vector.load %arg6[%c0_13, %c0_14] : memref<128x128xbf16, #tpu.memory_space<vmem>>, vector<128x128xbf16>
    %cst_15 = arith.constant dense<0.000000e+00> : vector<8x128xf32>
    %23 = tpu.matmul %21, %22, %cst_15 {dimension_numbers = #tpu.dot_dimension_numbers<[1], [0], [0], [1], [0, 0, 1, 1], [], []>} : vector<8x128xbf16>, vector<128x128xbf16>, vector<8x128xf32> -> vector<8x128xf32>
    %24 = arith.truncf %23 : vector<8x128xf32> to vector<8x128xbf16>
    %c0_16 = arith.constant 0 : index
    %c0_17 = arith.constant 0 : index
    %25 = vector.load %arg7[%c0_16, %c0_17] : memref<8x128xbf16, #tpu.memory_space<vmem>>, vector<8x128xbf16>
    tpu.vector_store %arg7[%c0_16, %c0_17], %24 {strides = array<i32>} : memref<8x128xbf16, #tpu.memory_space<vmem>>, vector<8x128xbf16>,
    return
  }
  func.func @transform_0(%arg0: i32) -> (i32, i32) {
    %c0_i32 = arith.constant 0 : i32
    %c0_i32_0 = arith.constant 0 : i32
    return %arg0, %c0_i32 : i32, i32
  }
  func.func @transform_1(%arg0: i32) -> (i32, i32) {
    %c0_i32 = arith.constant 0 : i32
    %c0_i32_0 = arith.constant 0 : i32
    return %arg0, %c0_i32 : i32, i32
  }
  func.func @transform_2(%arg0: i32) -> (i32, i32) {
    %c0_i32 = arith.constant 0 : i32
    %c0_i32_0 = arith.constant 0 : i32
    %c0_i32_1 = arith.constant 0 : i32
    return %c0_i32, %c0_i32_0 : i32, i32
  }
  func.func @transform_3(%arg0: i32) -> (i32, i32) {
    %c0_i32 = arith.constant 0 : i32
    %c0_i32_0 = arith.constant 0 : i32
    %c0_i32_1 = arith.constant 0 : i32
    return %c0_i32, %c0_i32_0 : i32, i32
  }
  func.func @transform_4(%arg0: i32) -> (i32, i32) {
    %c0_i32 = arith.constant 0 : i32
    %c0_i32_0 = arith.constant 0 : i32
    %c0_i32_1 = arith.constant 0 : i32
    return %c0_i32, %c0_i32_0 : i32, i32
  }
  func.func @transform_5(%arg0: i32) -> (i32, i32) {
    %c0_i32 = arith.constant 0 : i32
    %c0_i32_0 = arith.constant 0 : i32
    %c0_i32_1 = arith.constant 0 : i32
    return %c0_i32, %c0_i32_0 : i32, i32
  }
  func.func @transform_6(%arg0: i32) -> (i32, i32) {
    %c0_i32 = arith.constant 0 : i32
    %c0_i32_0 = arith.constant 0 : i32
    return %arg0, %c0_i32 : i32, i32
  }
}

</mosaic_0001>

<bundles_post_ra>
// kernel: tpu_custom_call.1
= control target key start
LH: loop header
LB: loop body
LE: loop exit
PB: predicated region body
PF: predicated region fallthrough
CT: control target
= control target key end

     0   :  { %11 = vsyncpa [#allocation3], 0  ;;  %s775_s0 = inlined_call_operand.vmem [shape: s32[8,1], index: 0, kind: input, shape index: {}]   ;;  %s776_s1 = inlined_call_operand.vmem [shape: f32[8,16], index: 1, kind: input, shape index: {}]   ;;  %s777_s2 = inlined_call_operand.vmem [shape: bf16[16,128], index: 2, kind: input, shape index: {}]   ;;  %s778_s3 = inlined_call_operand.hbm [shape: bf16[16,128], index: 3, kind: input, shape index: {}]   ;;  %s779_s4 = inlined_call_operand.hbm [shape: bf16[128,128], index: 4, kind: input, shape index: {}]   ;;  %s780_s5 = inlined_call_operand.hbm [shape: bf16[128,128], index: 5, kind: input, shape index: {}]   ;;  %s781_s6 = inlined_call_operand.hbm [shape: bf16[8,128], index: 6, kind: output, shape index: {}]  }
   0x1   :  { %12 = vsyncpa [#allocation6], 0 }
   0x2   :  { %13 = vsyncpa [#allocation4], 0  ;;  %s629_s21 = smov [#allocation5]   ;;  %s630_s23 = smov [#allocation2]  }
   0x3   :  { %s37_s22 = sshll.u32 %s629_s21, 4  ;;  %s25_s24 = sshll.u32 %s630_s23, 4  ;;  %s38_s22 = int_to_ptr.vmem [resolvable:$true] %s37_s22  ;;  %s673_s24 = int_to_ptr.vmem [resolvable:$true] %s25_s24 }
   0x4   :  { %s535_s27 = scalar_lea.hbm %s779_s4, 1024 }
   0x5   :  { %p536_p0 = scmp.ne.s32.totalorder %s779_s4, %s535_s27  ;;  %p539_p1 = scmp.lt.u32.totalorder %s535_s27, %s779_s4 }
   0x7   :  { %p541_p2 = pnand %p539_p1, %p536_p0 }
   0x9   :  { %544 = shalt.err (!%p541_p2)
}
   0xa   :  { %s545_s8 = scalar_lea.vmem %s38_s22, 1024  ;;  %p550_p4 = scmp.lt.s32.totalorder %s38_s22, %s38_s22 }
   0xb   :  { %p546_p3 = scmp.ne.s32.totalorder %s38_s22, %s545_s8  ;;  %p551_p5 = scmp.lt.s32.totalorder %s545_s8, %s545_s8 }
   0xd   :  { %p552_p6 = por %p551_p5, %p550_p4 }
   0xf   :  { %p553_p7 = pnand %p552_p6, %p546_p3 }
  0x11   :  { %556 = shalt.err (!%p553_p7)
}
  0x12   :  { %s631_s9 = smov 64   ;;  %s632_s10 = smov 4  }
  0x13   :  { %43 = dma.hbm_to_vmem [thread:$0]  %s779_s4, 1024, %s38_s22, [#allocation6], %s631_s9, %s631_s9, %s632_s10  }
  0x14   :  { %s557_s15 = scalar_lea.hbm %s778_s3, 128 }
  0x15   :  { %p558_p8 = scmp.ne.s32.totalorder %s778_s3, %s557_s15  ;;  %p561_p9 = scmp.lt.u32.totalorder %s557_s15, %s778_s3 }
  0x17   :  { %p563_p10 = pnand %p561_p9, %p558_p8 }
  0x19   :  { %566 = shalt.err (!%p563_p10)
}
  0x1a   :  { %s567_s20 = scalar_lea.vmem %s673_s24, 128  ;;  %p572_p12 = scmp.lt.s32.totalorder %s673_s24, %s673_s24 }
  0x1b   :  { %p568_p11 = scmp.ne.s32.totalorder %s673_s24, %s567_s20  ;;  %p573_p13 = scmp.lt.s32.totalorder %s567_s20, %s567_s20 }
  0x1d   :  { %p574_p0 = por %p573_p13, %p572_p12 }
  0x1f   :  { %p575_p1 = pnand %p574_p0, %p568_p11 }
  0x21   :  { %578 = shalt.err (!%p575_p1)
}
  0x22   :  { %31 = dma.hbm_to_vmem [thread:$0]  %s778_s3, 128, %s673_s24, [#allocation3], %s631_s9, %s631_s9, %s632_s10  }
  0x23   :  { %s633_s22 = smov [#allocation7]   ;;  %s579_s27 = scalar_lea.hbm %s780_s5, 1024 }
  0x24   :  { %s49_s23 = sshll.u32 %s633_s22, 4  ;;  %p580_p2 = scmp.ne.s32.totalorder %s780_s5, %s579_s27  ;;  %s50_s23 = int_to_ptr.vmem [resolvable:$true] %s49_s23 }
  0x25   :  { %p583_p3 = scmp.lt.u32.totalorder %s579_s27, %s780_s5 }
  0x27   :  { %p585_p4 = pnand %p583_p3, %p580_p2 }
  0x29   :  { %588 = shalt.err (!%p585_p4)
}
  0x2a   :  { %s589_s8 = scalar_lea.vmem %s50_s23, 1024  ;;  %p594_p6 = scmp.lt.s32.totalorder %s50_s23, %s50_s23 }
  0x2b   :  { %p590_p5 = scmp.ne.s32.totalorder %s50_s23, %s589_s8  ;;  %p595_p7 = scmp.lt.s32.totalorder %s589_s8, %s589_s8 }
  0x2d   :  { %p596_p8 = por %p595_p7, %p594_p6 }
  0x2f   :  { %p597_p9 = pnand %p596_p8, %p590_p5 }
  0x31   :  { %600 = shalt.err (!%p597_p9)
}
  0x32   :  { %55 = dma.hbm_to_vmem [thread:$0]  %s780_s5, 1024, %s50_s23, [#allocation6], %s631_s9, %s631_s9, %s632_s10  }
  0x33   :  { %623 = dma.done.wait [#allocation3], 128  }
  0x34   :  { %624 = vsyncadd [#allocation3], 4294967168 }
  0x35   :  { %625 = dma.done.wait [#allocation6], 2048  }
  0x36   :  { %626 = vsyncadd [#allocation6], 4294965248  ;;  %v634_v0 = vmov 0   ;;  %v635_v1 = vmov 0.0   ;;  %v66_v2 = vld [vmem:[%s775_s0] sm:$0xff]  ;;  %v517_v3 = vld [vmem:[#allocation2] sm:$0xff]   ;;  %v67_v7 = vlaneseq }
  0x37   :  { %516 = vset.pattern.permute.xlu0 %v634_v0  ;;  %460 = vmatprep.subr.bf16.mxu0 %v635_v1  ;;  %vm636_vm0 = vmmov 0   ;;  %v518_v4 = vld [vmem:[%s777_s2] sm:$0xff]   ;;  %vm84_vm1 = vcmask 130048   ;;  %v519_v11 = vld [vmem:[#allocation5] sm:$0xff]   ;;  %v521_v14 = vld [vmem:[#allocation5 + $0x10] sm:$0xff]   ;;  %s637_s0 = smov [#allocation8]  }
  0x38   :  { %454 = vmatprep.subr.bf16.mxu1 %v635_v1  ;;  %70 = vperm.xlu0 %516, %v66_v2   ;;  %v128_v5 = vld [vmem:[%s776_s1] sm:$0xff]  ;;  %v68_v8 = vand.u32 127, %v67_v7  ;;  %v522_v15 = vld [vmem:[#allocation5 + $0x18] sm:$0xff]   ;;  %v523_v16 = vld [vmem:[#allocation5 + $0x20] sm:$0xff]   ;;  %s401_s1 = sshll.u32 %s637_s0, 4  ;;  %s402_s1 = int_to_ptr.vmem [resolvable:$true] %s401_s1 }
  0x39   :  { %462 = vmatprep.mubr.msk.bf16.mxu0 %vm636_vm0, %v635_v1  ;;  %456 = vmatprep.mubr.msk.bf16.mxu1 %vm636_vm0, %v635_v1  ;;  %v129_v6 = vpack.c.bf16 %v128_v5, %v128_v5  ;;  %v520_v13 = vld [vmem:[#allocation5 + $0x8] sm:$0xff]   ;;  %v525_v18 = vld [vmem:[#allocation5 + $0x30] sm:$0xff]   ;;  %v526_v21 = vld [vmem:[#allocation5 + $0x38] sm:$0xff]   ;;  %s601_s2 = scalar_lea.vmem %s402_s1, 64  ;;  %p606_p11 = scmp.lt.s32.totalorder %s402_s1, %s402_s1 }
  0x3a   :  { %461 = vmatpush3.bf16.msra.mxu0 %v517_v3  ;;  %455 = vmatpush3.bf16.msra.mxu1 %v518_v4  ;;  %v524_v17 = vld [vmem:[#allocation5 + $0x28] sm:$0xff]   ;;  %v527_v24 = vld [vmem:[#allocation7] sm:$0xff]   ;;  %v529_v26 = vld [vmem:[#allocation7 + $0x10] sm:$0xff]   ;;  %p602_p10 = scmp.ne.s32.totalorder %s402_s1, %s601_s2  ;;  %p607_p12 = scmp.lt.s32.totalorder %s601_s2, %s601_s2 }
  0x3b   :  { %486 = vmatprep.subr.bf16.mxu0 %v635_v1  ;;  %466 = vmatprep.subr.bf16.mxu1 %v635_v1  ;;  %v528_v25 = vld [vmem:[#allocation7 + $0x8] sm:$0xff]   ;;  %v530_v27 = vld [vmem:[#allocation7 + $0x18] sm:$0xff]   ;;  %v531_v28 = vld [vmem:[#allocation7 + $0x20] sm:$0xff]  }
  0x3c   :  { %v532_v29 = vld [vmem:[#allocation7 + $0x28] sm:$0xff]   ;;  %v533_v30 = vld [vmem:[#allocation7 + $0x30] sm:$0xff]   ;;  %v534_v38 = vld [vmem:[#allocation7 + $0x38] sm:$0xff]   ;;  %p608_p13 = por %p607_p12, %p606_p11 }
  0x3d   :  { %463 = vmatmul.mubr.msk.bf16.vlgmr.msra.gmra.mrb[0].mxu0 %vm84_vm1, %v129_v6 }
  0x3e   :  { %502 = vmatprep.mubr.msk.bf16.mxu0 %vm636_vm0, %v635_v1  ;;  %487 = vmatpush3.bf16.msra.mxu0 %v527_v24  ;;  %p609_p0 = pnand %p608_p13, %p602_p10 }
  0x3f   :  { %488 = vmatprep.subr.bf16.mxu0 %v635_v1 }
  0x42   :  { %489 = vmatpush3.bf16.msra.mxu0 %v528_v25 }
  0x43   :  { %490 = vmatprep.subr.bf16.mxu0 %v635_v1 }
  0x46   :  { %491 = vmatpush3.bf16.msra.mxu0 %v529_v26 }
  0x47   :  { %492 = vmatprep.subr.bf16.mxu0 %v635_v1 }
  0x4a   :  { %493 = vmatpush3.bf16.msra.mxu0 %v530_v27 }
  0x4b   :  { %494 = vmatprep.subr.bf16.mxu0 %v635_v1 }
  0x4e   :  { %495 = vmatpush3.bf16.msra.mxu0 %v531_v28 }
  0x4f   :  { %496 = vmatprep.subr.bf16.mxu0 %v635_v1 }
  0x52   :  { %497 = vmatpush3.bf16.msra.mxu0 %v532_v29 }
  0x53   :  { %498 = vmatprep.subr.bf16.mxu0 %v635_v1 }
  0x56   :  { %499 = vmatpush3.bf16.msra.mxu0 %v533_v30 }
  0x57   :  { %500 = vmatprep.subr.bf16.mxu0 %v635_v1 }
  0x5a   :  { %501 = vmatpush3.bf16.msra.mxu0 %v534_v38 }
  0xb7   :  { %v71_v9 = vpop.permute.xlu0 %70 }
  0xb8   :  { %vm72_vm2 = vcmp.eq.s32.totalorder %v68_v8, %v71_v9 }
  0xb9   :  { %v411_v10 = vsel %vm72_vm2, 1.0, %v635_v1 }
  0xba   :  { %v75_v12 = vpack.c.bf16 %v411_v10, %v411_v10 }
  0xbc   :  { %457 = vmatmul.mubr.msk.bf16.vlgmr.msra.gmra.mrb[0].mxu1 %vm84_vm1, %v75_v12 }
  0xbd   :  { %467 = vmatpush3.bf16.msra.mxu1 %v519_v11  ;;  %482 = vmatprep.mubr.msk.bf16.mxu1 %vm636_vm0, %v635_v1 }
  0xbe   :  { %468 = vmatprep.subr.bf16.mxu1 %v635_v1 }
  0xc1   :  { %469 = vmatpush3.bf16.msra.mxu1 %v520_v13 }
  0xc2   :  { %470 = vmatprep.subr.bf16.mxu1 %v635_v1 }
  0xc5   :  { %471 = vmatpush3.bf16.msra.mxu1 %v521_v14 }
  0xc6   :  { %472 = vmatprep.subr.bf16.mxu1 %v635_v1 }
  0xc9   :  { %473 = vmatpush3.bf16.msra.mxu1 %v522_v15 }
  0xca   :  { %474 = vmatprep.subr.bf16.mxu1 %v635_v1 }
  0xcd   :  { %475 = vmatpush3.bf16.msra.mxu1 %v523_v16 }
  0xce   :  { %476 = vmatprep.subr.bf16.mxu1 %v635_v1 }
  0xd1   :  { %477 = vmatpush3.bf16.msra.mxu1 %v524_v17 }
  0xd2   :  { %478 = vmatprep.subr.bf16.mxu1 %v635_v1 }
  0xd5   :  { %479 = vmatpush3.bf16.msra.mxu1 %v525_v18 }
  0xd6   :  { %480 = vmatprep.subr.bf16.mxu1 %v635_v1 }
  0xd9   :  { %481 = vmatpush3.bf16.msra.mxu1 %v526_v21 }
 0x110   :  { %v175_v19 = vpop.f32.mrb[0].mxu0 }
 0x111   :  { %v464_v20 = vpop.f32.mrb[1].mxu0 }
 0x112   :  { %v178_v22 = vpop.f32.mrb[2].mxu0 }
 0x113   :  { %v465_v23 = vpop.f32.mrb[3].mxu0 }
 0x18f   :  { %v122_v31 = vpop.f32.mrb[0].mxu1 }
 0x190   :  { %v176_v32 = vadd.f32 %v175_v19, %v122_v31  ;;  %v458_v33 = vpop.f32.mrb[1].mxu1 }
 0x191   :  { %v125_v34 = vpop.f32.mrb[2].mxu1 }
 0x192   :  { %v181_v35 = vmax.f32 %v176_v32, 0.0  ;;  %v459_v36 = vpop.f32.mrb[3].mxu1 }
 0x194   :  { %v182_v37 = vpack.c.bf16 %v181_v35, %v181_v35 }
 0x196   :  { %483 = vmatmul.mubr.bf16.vlgmr.msra.gmra.mrb[4].mxu1 %v182_v37 }
 0x269   :  { %v281_v39 = vpop.f32.mrb[4].mxu1 }
 0x26a   :  { %v287_v40 = vmax.f32 %v281_v39, 0.0  ;;  %v484_v41 = vpop.f32.mrb[5].mxu1 }
 0x26b   :  { %v284_v42 = vpop.f32.mrb[6].mxu1 }
 0x26c   :  { %v288_v43 = vpack.c.bf16 %v287_v40, %v287_v40  ;;  %v485_v44 = vpop.f32.mrb[7].mxu1 }
 0x26e   :  { %503 = vmatmul.mubr.bf16.vlgmr.msra.gmra.mrb[4].mxu0 %v288_v43 }
 0x341   :  { %v387_v45 = vpop.f32.mrb[4].mxu0 }
 0x342   :  { %v393_v46 = vpack.c.bf16 %v387_v45, %v387_v45  ;;  %v504_v47 = vpop.f32.mrb[5].mxu0 }
 0x343   :  { %v390_v48 = vpop.f32.mrb[6].mxu0 }
 0x344   :  { %394 = vst [vmem:[#allocation8] sm:$0xf] %v393_v46  ;;  %v505_v49 = vpop.f32.mrb[7].mxu0 }
 0x345   :  { %612 = shalt.err (!%p609_p0)
}
 0x346   :  { %s613_s16 = scalar_lea.hbm %s781_s6, 64 }
 0x347   :  { %p614_p1 = scmp.ne.s32.totalorder %s781_s6, %s613_s16  ;;  %p617_p2 = scmp.lt.u32.totalorder %s613_s16, %s781_s6 }
 0x349   :  { %p619_p3 = pnand %p617_p2, %p614_p1 }
 0x34b   :  { %622 = shalt.err (!%p619_p3)
}
 0x34c   :  { %404 = dma.vmem_to_hbm [thread:$0]  %s402_s1, 64, %s781_s6, [#allocation4]  }
 0x34d   :  { %627 = dma.done.wait [#allocation4], 64  }
 0x34e   :  { %628 = vsyncadd [#allocation4], 4294967232 }
 0x34f   :  { %408 = vsyncpa [#allocation3], 1 }
 0x350   :  { %409 = vsyncpa [#allocation6], 1 }
 0x351   :  { %410 = vsyncpa [#allocation4], 1 }

</bundles_post_ra>
